<compile_context>
chip_gen: v7x
topology: tpu7x:2x2x1
jax: 0.10.0
libtpu: 0.0.40
codegen_flags: <defaults>
</compile_context>

<pallas_src>
import jax
import jax.numpy as jnp
from jax.experimental import pallas as pl
from jax.experimental.pallas import tpu as pltpu

LANE = 128      # TPU lane width (last-dim vreg extent)
SUBLANE = 8     # TPU sublane width (second-to-last-dim vreg extent)


def mlp_kernel(x_ref, w1_ref, b1_ref, w2_ref, b2_ref, w3_ref, b3_ref, o_ref):
    # fc1 + ReLU   (tile_b, n_in) @ (n_in, 128) -> (tile_b, 128), full-lane
    h1 = jnp.dot(x_ref[...], w1_ref[...], preferred_element_type=jnp.float32)
    h1 = jnp.maximum(h1 + b1_ref[...], 0.0)
    # fc2 + ReLU   (tile_b, 128) @ (128, 128) -> (tile_b, 128)
    h2 = jnp.dot(h1, w2_ref[...], preferred_element_type=jnp.float32)
    h2 = jnp.maximum(h2 + b2_ref[...], 0.0)
    # fc3 (no activation); output block is 128 lanes wide -> unmasked stores.
    out = jnp.dot(h2, w3_ref[...], preferred_element_type=jnp.float32)
    o_ref[...] = (out + b3_ref[...]).astype(o_ref.dtype)


def _round_up(n, m):
    return ((n + m - 1) // m) * m


def _pad_to(a, shape):
    pads = [(0, t - s) for s, t in zip(a.shape, shape)]
    if all(p == (0, 0) for p in pads):
        return a
    return jnp.pad(a, pads)


def network_setup_forward(x, w1, b1, w2, b2, w3, b3, *, tile_b=512,
                          single_step_max=512):
    """Fused forward pass of Network_setup (Linear-ReLU-Linear-ReLU-Linear)."""
    batch, n_in = x.shape
    n_mid = w1.shape[1]
    n_out = w3.shape[1]

    # One-time host-side zero-padding of the narrow feature dims to full
    # 128-lane tiles.  Exact: zero K-rows / N-cols contribute 0, ReLU(0)=0,
    # zero bias entries stay 0, and the padded output columns are sliced off.
    n_mid_p = _round_up(n_mid, LANE)
    n_out_p = _round_up(n_out, LANE)
    w1_p = _pad_to(w1, (n_in, n_mid_p))
    b1_p = _pad_to(b1, (1, n_mid_p))
    w2_p = _pad_to(w2, (n_mid_p, n_mid_p))
    b2_p = _pad_to(b2, (1, n_mid_p))
    w3_p = _pad_to(w3, (n_mid_p, n_out_p))
    b3_p = _pad_to(b3, (1, n_out_p))

    # Grid sizing: one step for small batches (blocks == full array dims, so no
    # (8,128) divisibility requirement and no batch padding at all); otherwise
    # tile_b rows per step with Pallas handling the ragged edge block (garbage
    # there is confined to output rows >= batch, which never reach HBM).
    if batch <= single_step_max:
        tile_b = batch
    else:
        assert tile_b % SUBLANE == 0, "tile_b must be a multiple of 8 (sublane)"
    grid = (pl.cdiv(batch, tile_b),)

    # Whole-array blocks with a constant block index: fetched once, then kept
    # VMEM-resident across all grid steps.
    def resident(a):
        return pl.BlockSpec(a.shape, lambda i: (0,) * a.ndim)

    itemsize = jnp.dtype(jnp.float32).itemsize
    cost = pl.CostEstimate(
        flops=2 * batch * (n_in * n_mid_p + n_mid_p * n_mid_p + n_mid_p * n_out_p),
        transcendentals=0,
        bytes_accessed=itemsize * (
            x.size + w1_p.size + b1_p.size + w2_p.size + b2_p.size
            + w3_p.size + b3_p.size + batch * n_out_p),
    )

    out_p = pl.pallas_call(
        mlp_kernel,
        out_shape=jax.ShapeDtypeStruct((batch, n_out_p), jnp.float32),
        grid=grid,
        in_specs=[
            pl.BlockSpec((tile_b, n_in), lambda i: (i, 0)),   # x: tiled over batch
            resident(w1_p), resident(b1_p),
            resident(w2_p), resident(b2_p),
            resident(w3_p), resident(b3_p),
        ],
        out_specs=pl.BlockSpec((tile_b, n_out_p), lambda i: (i, 0)),
        compiler_params=pltpu.CompilerParams(
            dimension_semantics=("parallel",),  # megacore split when the grid is deep
        ),
        cost_estimate=cost,
    )(x, w1_p, b1_p, w2_p, b2_p, w3_p, b3_p)

    # Drop the zero head-padding columns.
    # TODO(synk): at scale, fuse this 16-wide head into the downstream consumer
    # instead of padding the output to 128 lanes.
    return out_p[:, :n_out]


def reference_forward(x, w1, b1, w2, b2, w3, b3):
    h1 = jnp.maximum(x @ w1 + b1, 0.0)
    h2 = jnp.maximum(h1 @ w2 + b2, 0.0)
    return h2 @ w3 + b3


def init_linear(key, fan_in, fan_out):
    """Deterministic init matching PyTorch nn.Linear defaults:
    uniform(-1/sqrt(fan_in), 1/sqrt(fan_in)) for weight and bias.
    Weight returned as (fan_in, fan_out) for the x @ W layout."""
    kw, kb = jax.random.split(key)
    bound = 1.0 / jnp.sqrt(jnp.float32(fan_in))
    w = jax.random.uniform(kw, (fan_in, fan_out), jnp.float32, -bound, bound)
    b = jax.random.uniform(kb, (1, fan_out), jnp.float32, -bound, bound)
    return w, b


if __name__ == "__main__":
    # Shapes consistent with the module: number_in=32, number_middle=64,
    # number_out=16.
    number_in, number_middle, number_out = 32, 64, 16

    key = jax.random.PRNGKey(0)
    kx, k1, k2, k3 = jax.random.split(key, 4)
    w1, b1 = init_linear(k1, number_in, number_middle)
    w2, b2 = init_linear(k2, number_middle, number_middle)
    w3, b3 = init_linear(k3, number_middle, number_out)

    # Case 1: small batch (50 rows, not a multiple of 8) -> single grid step.
    x_small = jax.random.uniform(kx, (50, number_in), jnp.float32)  # like mnist/255
    out_small = network_setup_forward(x_small, w1, b1, w2, b2, w3, b3)
    jax.block_until_ready(out_small)
    ref_small = reference_forward(x_small, w1, b1, w2, b2, w3, b3)
    assert out_small.shape == (50, number_out)
    assert jnp.allclose(out_small, ref_small, atol=1e-5, rtol=1e-5)

    # Case 2: batch with a ragged edge -> tiled grid (3 steps of 512 rows),
    # exercising the no-pad edge-block path.
    x_big = jax.random.uniform(jax.random.PRNGKey(1), (1100, number_in), jnp.float32)
    out_big = network_setup_forward(x_big, w1, b1, w2, b2, w3, b3)
    jax.block_until_ready(out_big)
    ref_big = reference_forward(x_big, w1, b1, w2, b2, w3, b3)
    assert out_big.shape == (1100, number_out)
    assert jnp.allclose(out_big, ref_big, atol=1e-5, rtol=1e-5)

    print("KERNEL_OK")
</pallas_src>

<mosaic_0001>
module attributes {stable_mosaic.version = 11 : i64} {
  func.func @mlp_kernel(%arg0: i32, %arg1: memref<50x32xf32, #tpu.memory_space<vmem>>, %arg2: memref<32x128xf32, #tpu.memory_space<vmem>>, %arg3: memref<1x128xf32, #tpu.memory_space<vmem>>, %arg4: memref<128x128xf32, #tpu.memory_space<vmem>>, %arg5: memref<1x128xf32, #tpu.memory_space<vmem>>, %arg6: memref<128x128xf32, #tpu.memory_space<vmem>>, %arg7: memref<1x128xf32, #tpu.memory_space<vmem>>, %arg8: memref<50x128xf32, #tpu.memory_space<vmem>>) attributes {dimension_semantics = [#tpu.dimension_semantics<parallel>], iteration_bounds = array<i64: 1>, scalar_prefetch = 0 : i64, scratch_operands = 0 : i64, tpu.core_type = #tpu.core_type<tc>, window_params = [{transform_indices = @transform_0, window_bounds = array<i64: 50, 32>}, {pipeline_mode = #tpu.pipeline_mode<synchronous>, transform_indices = @transform_1, window_bounds = array<i64: 32, 128>}, {pipeline_mode = #tpu.pipeline_mode<synchronous>, transform_indices = @transform_2, window_bounds = array<i64: 1, 128>}, {pipeline_mode = #tpu.pipeline_mode<synchronous>, transform_indices = @transform_3, window_bounds = array<i64: 128, 128>}, {pipeline_mode = #tpu.pipeline_mode<synchronous>, transform_indices = @transform_4, window_bounds = array<i64: 1, 128>}, {pipeline_mode = #tpu.pipeline_mode<synchronous>, transform_indices = @transform_5, window_bounds = array<i64: 128, 128>}, {pipeline_mode = #tpu.pipeline_mode<synchronous>, transform_indices = @transform_6, window_bounds = array<i64: 1, 128>}, {transform_indices = @transform_7, window_bounds = array<i64: 50, 128>}]} {
    %c0 = arith.constant 0 : index
    %c0_0 = arith.constant 0 : index
    %0 = vector.load %arg1[%c0, %c0_0] : memref<50x32xf32, #tpu.memory_space<vmem>>, vector<50x32xf32>
    %c0_1 = arith.constant 0 : index
    %c0_2 = arith.constant 0 : index
    %1 = vector.load %arg2[%c0_1, %c0_2] : memref<32x128xf32, #tpu.memory_space<vmem>>, vector<32x128xf32>
    %cst = arith.constant dense<0.000000e+00> : vector<50x128xf32>
    %2 = tpu.matmul %0, %1, %cst {dimension_numbers = #tpu.dot_dimension_numbers<[1], [0], [0], [1], [0, 0, 1, 1], [], []>} : vector<50x32xf32>, vector<32x128xf32>, vector<50x128xf32> -> vector<50x128xf32>
    %c0_3 = arith.constant 0 : index
    %c0_4 = arith.constant 0 : index
    %3 = vector.load %arg3[%c0_3, %c0_4] : memref<1x128xf32, #tpu.memory_space<vmem>>, vector<1x128xf32>
    %4 = vector.broadcast %3 : vector<1x128xf32> to vector<50x128xf32>
    %5 = arith.addf %2, %4 : vector<50x128xf32>
    %cst_5 = arith.constant 0.000000e+00 : f32
    %6 = vector.broadcast %cst_5 : f32 to vector<50x128xf32>
    %7 = arith.maximumf %5, %6 : vector<50x128xf32>
    %c0_6 = arith.constant 0 : index
    %c0_7 = arith.constant 0 : index
    %8 = vector.load %arg4[%c0_6, %c0_7] : memref<128x128xf32, #tpu.memory_space<vmem>>, vector<128x128xf32>
    %cst_8 = arith.constant dense<0.000000e+00> : vector<50x128xf32>
    %9 = tpu.matmul %7, %8, %cst_8 {dimension_numbers = #tpu.dot_dimension_numbers<[1], [0], [0], [1], [0, 0, 1, 1], [], []>} : vector<50x128xf32>, vector<128x128xf32>, vector<50x128xf32> -> vector<50x128xf32>
    %c0_9 = arith.constant 0 : index
    %c0_10 = arith.constant 0 : index
    %10 = vector.load %arg5[%c0_9, %c0_10] : memref<1x128xf32, #tpu.memory_space<vmem>>, vector<1x128xf32>
    %11 = vector.broadcast %10 : vector<1x128xf32> to vector<50x128xf32>
    %12 = arith.addf %9, %11 : vector<50x128xf32>
    %cst_11 = arith.constant 0.000000e+00 : f32
    %13 = vector.broadcast %cst_11 : f32 to vector<50x128xf32>
    %14 = arith.maximumf %12, %13 : vector<50x128xf32>
    %c0_12 = arith.constant 0 : index
    %c0_13 = arith.constant 0 : index
    %15 = vector.load %arg6[%c0_12, %c0_13] : memref<128x128xf32, #tpu.memory_space<vmem>>, vector<128x128xf32>
    %cst_14 = arith.constant dense<0.000000e+00> : vector<50x128xf32>
    %16 = tpu.matmul %14, %15, %cst_14 {dimension_numbers = #tpu.dot_dimension_numbers<[1], [0], [0], [1], [0, 0, 1, 1], [], []>} : vector<50x128xf32>, vector<128x128xf32>, vector<50x128xf32> -> vector<50x128xf32>
    %c0_15 = arith.constant 0 : index
    %c0_16 = arith.constant 0 : index
    %17 = vector.load %arg7[%c0_15, %c0_16] : memref<1x128xf32, #tpu.memory_space<vmem>>, vector<1x128xf32>
    %18 = vector.broadcast %17 : vector<1x128xf32> to vector<50x128xf32>
    %19 = arith.addf %16, %18 : vector<50x128xf32>
    %c0_17 = arith.constant 0 : index
    %c0_18 = arith.constant 0 : index
    %20 = vector.load %arg8[%c0_17, %c0_18] : memref<50x128xf32, #tpu.memory_space<vmem>>, vector<50x128xf32>
    tpu.vector_store %arg8[%c0_17, %c0_18], %19 {strides = array<i32>} : memref<50x128xf32, #tpu.memory_space<vmem>>, vector<50x128xf32>,
    return
  }
  func.func @transform_0(%arg0: i32) -> (i32, i32) {
    %c0_i32 = arith.constant 0 : i32
    %c0_i32_0 = arith.constant 0 : i32
    return %arg0, %c0_i32 : i32, i32
  }
  func.func @transform_1(%arg0: i32) -> (i32, i32) {
    %c0_i32 = arith.constant 0 : i32
    %c0_i32_0 = arith.constant 0 : i32
    %c0_i32_1 = arith.constant 0 : i32
    return %c0_i32, %c0_i32_0 : i32, i32
  }
  func.func @transform_2(%arg0: i32) -> (i32, i32) {
    %c0_i32 = arith.constant 0 : i32
    %c0_i32_0 = arith.constant 0 : i32
    %c0_i32_1 = arith.constant 0 : i32
    return %c0_i32, %c0_i32_0 : i32, i32
  }
  func.func @transform_3(%arg0: i32) -> (i32, i32) {
    %c0_i32 = arith.constant 0 : i32
    %c0_i32_0 = arith.constant 0 : i32
    %c0_i32_1 = arith.constant 0 : i32
    return %c0_i32, %c0_i32_0 : i32, i32
  }
  func.func @transform_4(%arg0: i32) -> (i32, i32) {
    %c0_i32 = arith.constant 0 : i32
    %c0_i32_0 = arith.constant 0 : i32
    %c0_i32_1 = arith.constant 0 : i32
    return %c0_i32, %c0_i32_0 : i32, i32
  }
  func.func @transform_5(%arg0: i32) -> (i32, i32) {
    %c0_i32 = arith.constant 0 : i32
    %c0_i32_0 = arith.constant 0 : i32
    %c0_i32_1 = arith.constant 0 : i32
    return %c0_i32, %c0_i32_0 : i32, i32
  }
  func.func @transform_6(%arg0: i32) -> (i32, i32) {
    %c0_i32 = arith.constant 0 : i32
    %c0_i32_0 = arith.constant 0 : i32
    %c0_i32_1 = arith.constant 0 : i32
    return %c0_i32, %c0_i32_0 : i32, i32
  }
  func.func @transform_7(%arg0: i32) -> (i32, i32) {
    %c0_i32 = arith.constant 0 : i32
    %c0_i32_0 = arith.constant 0 : i32
    return %arg0, %c0_i32 : i32, i32
  }
}

</mosaic_0001>

<bundles_post_ra>
// kernel: tpu_custom_call.1
= control target key start
LH: loop header
LB: loop body
LE: loop exit
PB: predicated region body
PF: predicated region fallthrough
CT: control target
= control target key end

     0   :  { %12 = vsyncpa [#allocation3], 0  ;;  %s1018_s0 = inlined_call_operand.vmem [shape: f32[50,32], index: 0, kind: input, shape index: {}]   ;;  %s1019_s1 = inlined_call_operand.vmem [shape: f32[32,128], index: 1, kind: input, shape index: {}]   ;;  %s1020_s2 = inlined_call_operand.vmem [shape: f32[1,128], index: 2, kind: input, shape index: {}]   ;;  %s1021_s3 = inlined_call_operand.hbm [shape: f32[128,128], index: 3, kind: input, shape index: {}]   ;;  %s1022_s4 = inlined_call_operand.vmem [shape: f32[1,128], index: 4, kind: input, shape index: {}]   ;;  %s1023_s5 = inlined_call_operand.hbm [shape: f32[128,128], index: 5, kind: input, shape index: {}]   ;;  %s1024_s6 = inlined_call_operand.vmem [shape: f32[1,128], index: 6, kind: input, shape index: {}]   ;;  %s1025_s7 = inlined_call_operand.hbm [shape: f32[50,128], index: 7, kind: output, shape index: {}]  }
   0x1   :  { %13 = vsyncpa [#allocation6], 0 }
   0x2   :  { %14 = vsyncpa [#allocation4], 0  ;;  %s816_s24 = smov [#allocation2]   ;;  %s744_s28 = scalar_lea.hbm %s1021_s3, 2048 }
   0x3   :  { %s26_s25 = sshll.u32 %s816_s24, 4  ;;  %p745_p0 = scmp.ne.s32.totalorder %s1021_s3, %s744_s28  ;;  %s27_s25 = int_to_ptr.vmem [resolvable:$true] %s26_s25 }
   0x4   :  { %p748_p1 = scmp.lt.u32.totalorder %s744_s28, %s1021_s3 }
   0x6   :  { %p750_p2 = pnand %p748_p1, %p745_p0 }
   0x8   :  { %753 = shalt.err (!%p750_p2)
}
   0x9   :  { %s754_s10 = scalar_lea.vmem %s27_s25, 2048  ;;  %p759_p4 = scmp.lt.s32.totalorder %s27_s25, %s27_s25 }
   0xa   :  { %p755_p3 = scmp.ne.s32.totalorder %s27_s25, %s754_s10  ;;  %p760_p5 = scmp.lt.s32.totalorder %s754_s10, %s754_s10 }
   0xc   :  { %p761_p6 = por %p760_p5, %p759_p4 }
   0xe   :  { %p762_p7 = pnand %p761_p6, %p755_p3 }
  0x10   :  { %765 = shalt.err (!%p762_p7)
}
  0x11   :  { %s817_s11 = smov 128   ;;  %s818_s12 = smov 8  }
  0x12   :  { %32 = dma.hbm_to_vmem [thread:$0]  %s1021_s3, 2048, %s27_s25, [#allocation3], %s817_s11, %s817_s11, %s818_s12  }
  0x13   :  { %s819_s15 = smov [#allocation5]   ;;  %s766_s19 = scalar_lea.hbm %s1023_s5, 2048 }
  0x14   :  { %s40_s16 = sshll.u32 %s819_s15, 4  ;;  %p767_p8 = scmp.ne.s32.totalorder %s1023_s5, %s766_s19  ;;  %s41_s16 = int_to_ptr.vmem [resolvable:$true] %s40_s16 }
  0x15   :  { %p770_p9 = scmp.lt.u32.totalorder %s766_s19, %s1023_s5 }
  0x17   :  { %p772_p10 = pnand %p770_p9, %p767_p8 }
  0x19   :  { %775 = shalt.err (!%p772_p10)
}
  0x1a   :  { %s776_s24 = scalar_lea.vmem %s41_s16, 2048  ;;  %p781_p12 = scmp.lt.s32.totalorder %s41_s16, %s41_s16 }
  0x1b   :  { %p777_p11 = scmp.ne.s32.totalorder %s41_s16, %s776_s24  ;;  %p782_p13 = scmp.lt.s32.totalorder %s776_s24, %s776_s24 }
  0x1d   :  { %p783_p0 = por %p782_p13, %p781_p12 }
  0x1f   :  { %p784_p1 = pnand %p783_p0, %p777_p11 }
  0x21   :  { %787 = shalt.err (!%p784_p1)
}
  0x22   :  { %46 = dma.hbm_to_vmem [thread:$0]  %s1023_s5, 2048, %s41_s16, [#allocation6], %s817_s11, %s817_s11, %s818_s12  }
  0x23   :  { %810 = dma.done.wait [#allocation3], 2048  }
  0x24   :  { %811 = vsyncadd [#allocation3], 4294965248 }
  0x25   :  { %812 = dma.done.wait [#allocation6], 2048  }
  0x26   :  { %813 = vsyncadd [#allocation6], 4294965248  ;;  %v820_v0 = vmov 0.0|0.0   ;;  %vm821_vm0 = vmmov 0   ;;  %v822_v1 = vmov 0.0   ;;  %v62_v2 = vld [vmem:[%s1019_s1] sm:$0xff] }
  0x27   :  { %682 = vmatprep.subr.bf16.mxu0 %v820_v0  ;;  %555 = vmatprep.mubr.msk.f32.mxu0 %vm821_vm0, %v822_v1  ;;  %v63_v3 = vld [vmem:[%s1019_s1 + $0x8] sm:$0xff]  ;;  %v64_v4 = vld [vmem:[%s1019_s1 + $0x10] sm:$0xff]  ;;  %v65_v6 = vld [vmem:[%s1019_s1 + $0x18] sm:$0xff]  ;;  %vm73_vm1 = vcmask 261120  }
  0x28   :  { %688 = vmatprep.subr.bf16.mxu1 %v820_v0  ;;  %608 = vmatprep.mubr.msk.f32.mxu1 %vm821_vm0, %v822_v1  ;;  %v683_v5 = vpack.c.bf16 %v63_v3, %v62_v2  ;;  %v686_v7 = vpack.c.bf16 %v65_v6, %v64_v4  ;;  %v202_v8 = vld [vmem:[#allocation2] sm:$0xff]  ;;  %v203_v9 = vld [vmem:[#allocation2 + $0x8] sm:$0xff]  ;;  %v204_v10 = vld [vmem:[#allocation2 + $0x10] sm:$0xff] }
  0x29   :  { %v205_v11 = vld [vmem:[#allocation2 + $0x18] sm:$0xff]  ;;  %v689_v12 = vpack.c.bf16 %v203_v9, %v202_v8  ;;  %v55_v13 = vld [vmem:[%s1018_s0] sm:$0xff]  ;;  %v207_v16 = vld [vmem:[#allocation2 + $0x28] sm:$0xff] }
  0x2a   :  { %684 = vmatpush3.bf16.msra.mxu0 %v683_v5  ;;  %v692_v14 = vpack.c.bf16 %v205_v11, %v204_v10  ;;  %v206_v15 = vld [vmem:[#allocation2 + $0x20] sm:$0xff]  ;;  %v56_v17 = vld [vmem:[%s1018_s0 + $0x8] sm:$0xff]  ;;  %v208_v19 = vld [vmem:[#allocation2 + $0x30] sm:$0xff] }
  0x2b   :  { %685 = vmatprep.subr.bf16.mxu0 %v820_v0  ;;  %690 = vmatpush3.bf16.msra.mxu1 %v689_v12  ;;  %v695_v18 = vpack.c.bf16 %v207_v16, %v206_v15  ;;  %v209_v20 = vld [vmem:[#allocation2 + $0x38] sm:$0xff]  ;;  %v57_v21 = vld [vmem:[%s1018_s0 + $0x10] sm:$0xff]  ;;  %v210_v23 = vld [vmem:[#allocation2 + $0x40] sm:$0xff] }
  0x2c   :  { %691 = vmatprep.subr.bf16.mxu1 %v820_v0  ;;  %v698_v22 = vpack.c.bf16 %v209_v20, %v208_v19  ;;  %v211_v24 = vld [vmem:[#allocation2 + $0x48] sm:$0xff]  ;;  %v58_v25 = vld [vmem:[%s1018_s0 + $0x18] sm:$0xff]  ;;  %v212_v27 = vld [vmem:[#allocation2 + $0x50] sm:$0xff] }
  0x2d   :  { %v701_v26 = vpack.c.bf16 %v211_v24, %v210_v23  ;;  %v213_v28 = vld [vmem:[#allocation2 + $0x58] sm:$0xff]  ;;  %v59_v29 = vld [vmem:[%s1018_s0 + $0x20] sm:$0xff]  ;;  %v215_v32 = vld [vmem:[#allocation2 + $0x68] sm:$0xff] }
  0x2e   :  { %687 = vmatpush3.bf16.msra.mxu0 %v686_v7  ;;  %v704_v30 = vpack.c.bf16 %v213_v28, %v212_v27  ;;  %v214_v31 = vld [vmem:[#allocation2 + $0x60] sm:$0xff]  ;;  %v60_v33 = vld [vmem:[%s1018_s0 + $0x28] sm:$0xff]  ;;  %v61_v35 = vld [vmem:[%s1018_s0 + $0x30] sm:$0x3] }
  0x2f   :  { %712 = vmatprep.subr.bf16.mxu0 %v820_v0  ;;  %693 = vmatpush3.bf16.msra.mxu1 %v692_v14  ;;  %v707_v34 = vpack.c.bf16 %v215_v32, %v214_v31  ;;  %v216_v36 = vld [vmem:[#allocation2 + $0x70] sm:$0xff]  ;;  %v217_v37 = vld [vmem:[#allocation2 + $0x78] sm:$0xff]  ;;  %v332_v39 = vld [vmem:[#allocation5] sm:$0xff] }
  0x30   :  { %694 = vmatprep.subr.bf16.mxu1 %v820_v0  ;;  %v710_v38 = vpack.c.bf16 %v217_v37, %v216_v36  ;;  %v333_v40 = vld [vmem:[#allocation5 + $0x8] sm:$0xff]  ;;  %v334_v41 = vld [vmem:[#allocation5 + $0x10] sm:$0xff]  ;;  %v335_v43 = vld [vmem:[#allocation5 + $0x18] sm:$0xff] }
  0x31   :  { %556 = vmatmul.mubr.msk.f32.vlgmr.msra.gmra.mrb[0].mxu0 %vm73_vm1, %v55_v13  ;;  %v713_v42 = vpack.c.bf16 %v333_v40, %v332_v39  ;;  %v716_v44 = vpack.c.bf16 %v335_v43, %v334_v41  ;;  %v336_v45 = vld [vmem:[#allocation5 + $0x20] sm:$0xff]  ;;  %v337_v46 = vld [vmem:[#allocation5 + $0x28] sm:$0xff]  ;;  %v338_v48 = vld [vmem:[#allocation5 + $0x30] sm:$0xff] }
  0x32   :  { %558 = vmatprep.mubr.msk.f32.mxu0 %vm821_vm0, %v822_v1  ;;  %v719_v47 = vpack.c.bf16 %v337_v46, %v336_v45  ;;  %v339_v49 = vld [vmem:[#allocation5 + $0x38] sm:$0xff]  ;;  %v340_v51 = vld [vmem:[#allocation5 + $0x40] sm:$0xff]  ;;  %v341_v52 = vld [vmem:[#allocation5 + $0x48] sm:$0xff] }
  0x33   :  { %696 = vmatpush3.bf16.msra.mxu1 %v695_v18  ;;  %714 = vmatpush3.bf16.msra.mxu0 %v713_v42  ;;  %v722_v50 = vpack.c.bf16 %v339_v49, %v338_v48  ;;  %v725_v53 = vpack.c.bf16 %v341_v52, %v340_v51  ;;  %v342_v54 = vld [vmem:[#allocation5 + $0x50] sm:$0xff]  ;;  %v343_v55 = vld [vmem:[#allocation5 + $0x58] sm:$0xff]  ;;  %v344_v57 = vld [vmem:[#allocation5 + $0x60] sm:$0xff] }
  0x34   :  { %697 = vmatprep.subr.bf16.mxu1 %v820_v0  ;;  %715 = vmatprep.subr.bf16.mxu0 %v820_v0  ;;  %v728_v56 = vpack.c.bf16 %v343_v55, %v342_v54  ;;  %v345_v58 = vld [vmem:[#allocation5 + $0x68] sm:$0xff]  ;;  %v480_v60 = vld [vmem:[%s1020_s2] ss:$0 sm:$0xff]  ;;  %v347_v27 = vld [vmem:[#allocation5 + $0x78] sm:$0xff] }
  0x35   :  { %559 = vmatmul.mubr.msk.f32.gmra.mrb[2].mxu0 %vm73_vm1, %v56_v17  ;;  %v731_v59 = vpack.c.bf16 %v345_v58, %v344_v57  ;;  %v489_v58 = vld [vmem:[%s1024_s6] ss:$0 sm:$0xff]  ;;  %s823_s6 = smov [#allocation7]  }
  0x36   :  { %561 = vmatprep.mubr.msk.f32.mxu0 %vm821_vm0, %v822_v1  ;;  %s467_s27 = sshll.u32 %s823_s6, 4  ;;  %s468_s27 = int_to_ptr.vmem [resolvable:$true] %s467_s27 }
  0x37   :  { %699 = vmatpush3.bf16.msra.mxu1 %v698_v22  ;;  %717 = vmatpush3.bf16.msra.mxu0 %v716_v44  ;;  %s788_s5 = scalar_lea.vmem %s468_s27, 896  ;;  %p793_p3 = scmp.lt.s32.totalorder %s468_s27, %s468_s27 }
  0x38   :  { %700 = vmatprep.subr.bf16.mxu1 %v820_v0  ;;  %718 = vmatprep.subr.bf16.mxu0 %v820_v0  ;;  %p789_p2 = scmp.ne.s32.totalorder %s468_s27, %s788_s5  ;;  %p794_p4 = scmp.lt.s32.totalorder %s788_s5, %s788_s5 }
  0x39   :  { %562 = vmatmul.mubr.msk.f32.gmra.mrb[4].mxu0 %vm73_vm1, %v57_v21 }
  0x3a   :  { %564 = vmatprep.mubr.msk.f32.mxu0 %vm821_vm0, %v822_v1  ;;  %p795_p5 = por %p794_p4, %p793_p3 }
  0x3b   :  { %702 = vmatpush3.bf16.msra.mxu1 %v701_v26  ;;  %720 = vmatpush3.bf16.msra.mxu0 %v719_v47  ;;  %v346_v26 = vld [vmem:[#allocation5 + $0x70] sm:$0xff] }
  0x3c   :  { %703 = vmatprep.subr.bf16.mxu1 %v820_v0  ;;  %721 = vmatprep.subr.bf16.mxu0 %v820_v0  ;;  %v734_v28 = vpack.c.bf16 %v347_v27, %v346_v26  ;;  %p796_p6 = pnand %p795_p5, %p789_p2 }
  0x3d   :  { %565 = vmatmul.mubr.msk.f32.gmra.mrb[6].mxu0 %vm73_vm1, %v58_v25 }
  0x3e   :  { %567 = vmatprep.mubr.msk.f32.mxu0 %vm821_vm0, %v822_v1 }
  0x3f   :  { %705 = vmatpush3.bf16.msra.mxu1 %v704_v30  ;;  %723 = vmatpush3.bf16.msra.mxu0 %v722_v50 }
  0x40   :  { %706 = vmatprep.subr.bf16.mxu1 %v820_v0  ;;  %724 = vmatprep.subr.bf16.mxu0 %v820_v0 }
  0x41   :  { %568 = vmatmul.mubr.msk.f32.gmra.mrb[8].mxu0 %vm73_vm1, %v59_v29  ;;  %v488_v29 = vld [vmem:[%s1022_s4] ss:$0 sm:$0xff] }
  0x42   :  { %570 = vmatprep.mubr.msk.f32.mxu0 %vm821_vm0, %v822_v1 }
  0x43   :  { %708 = vmatpush3.bf16.msra.mxu1 %v707_v34  ;;  %726 = vmatpush3.bf16.msra.mxu0 %v725_v53 }
  0x44   :  { %709 = vmatprep.subr.bf16.mxu1 %v820_v0  ;;  %727 = vmatprep.subr.bf16.mxu0 %v820_v0 }
  0x45   :  { %571 = vmatmul.mubr.msk.f32.gmra.mrb[10].mxu0 %vm73_vm1, %v60_v33 }
  0x46   :  { %573 = vmatprep.mubr.msk.f32.mxu0 %vm821_vm0, %v822_v1 }
  0x47   :  { %711 = vmatpush3.bf16.msra.mxu1 %v710_v38  ;;  %729 = vmatpush3.bf16.msra.mxu0 %v728_v56 }
  0x48   :  { %730 = vmatprep.subr.bf16.mxu0 %v820_v0 }
  0x49   :  { %574 = vmatmul.mubr.msk.f32.gmra.mrb[12].mxu0 %vm73_vm1, %v61_v35 }
  0x4a   :  { %661 = vmatprep.mubr.msk.f32.mxu0 %vm821_vm0, %v822_v1 }
  0x4b   :  { %732 = vmatpush3.bf16.msra.mxu0 %v731_v59 }
  0x4c   :  { %733 = vmatprep.subr.bf16.mxu0 %v820_v0 }
  0x4f   :  { %735 = vmatpush3.bf16.msra.mxu0 %v734_v28 }
 0x104   :  { %v161_v61 = vpop.f32.mrb[0].mxu0 }
 0x105   :  { %v162_v62 = vadd.f32 %v480_v60, %v161_v61  ;;  %v557_v63 = vpop.f32.mrb[1].mxu0 }
 0x107   :  { %v195_v2 = vmax.f32 %v162_v62, 0.0 }
 0x108   :  { %v166_v3 = vpop.f32.mrb[2].mxu0 }
 0x109   :  { %v167_v4 = vadd.f32 %v480_v60, %v166_v3  ;;  %v560_v5 = vpop.f32.mrb[3].mxu0  ;;  %609 = vmatmul.mubr.f32.vlgmr.msra.gmra.mrb[0].mxu1 %v195_v2 }
 0x10a   :  { %611 = vmatprep.mubr.msk.f32.mxu1 %vm821_vm0, %v822_v1 }
 0x10b   :  { %v196_v6 = vmax.f32 %v167_v4, 0.0 }
 0x10c   :  { %v171_v7 = vpop.f32.mrb[4].mxu0 }
 0x10d   :  { %v172_v8 = vadd.f32 %v480_v60, %v171_v7  ;;  %v563_v9 = vpop.f32.mrb[5].mxu0  ;;  %612 = vmatmul.mubr.f32.gmra.mrb[2].mxu1 %v196_v6 }
 0x10e   :  { %614 = vmatprep.mubr.msk.f32.mxu1 %vm821_vm0, %v822_v1 }
 0x10f   :  { %v197_v0 = vmax.f32 %v172_v8, 0.0 }
 0x110   :  { %v176_v10 = vpop.f32.mrb[6].mxu0 }
 0x111   :  { %v177_v11 = vadd.f32 %v480_v60, %v176_v10  ;;  %v566_v12 = vpop.f32.mrb[7].mxu0  ;;  %615 = vmatmul.mubr.f32.gmra.mrb[4].mxu1 %v197_v0 }
 0x112   :  { %617 = vmatprep.mubr.msk.f32.mxu1 %vm821_vm0, %v822_v1 }
 0x113   :  { %v198_v13 = vmax.f32 %v177_v11, 0.0 }
 0x114   :  { %v181_v14 = vpop.f32.mrb[8].mxu0 }
 0x115   :  { %v182_v15 = vadd.f32 %v480_v60, %v181_v14  ;;  %v569_v16 = vpop.f32.mrb[9].mxu0  ;;  %618 = vmatmul.mubr.f32.gmra.mrb[6].mxu1 %v198_v13 }
 0x116   :  { %620 = vmatprep.mubr.msk.f32.mxu1 %vm821_vm0, %v822_v1 }
 0x117   :  { %v199_v17 = vmax.f32 %v182_v15, 0.0 }
 0x118   :  { %v186_v18 = vpop.f32.mrb[10].mxu0 }
 0x119   :  { %v187_v19 = vadd.f32 %v480_v60, %v186_v18  ;;  %v572_v20 = vpop.f32.mrb[11].mxu0  ;;  %621 = vmatmul.mubr.f32.gmra.mrb[8].mxu1 %v199_v17 }
 0x11a   :  { %623 = vmatprep.mubr.msk.f32.mxu1 %vm821_vm0, %v822_v1 }
 0x11b   :  { %v200_v21 = vmax.f32 %v187_v19, 0.0 }
 0x11c   :  { %v191_v22 = vpop.f32.mrb[12].mxu0 }
 0x11d   :  { %v192_v23 = vadd.f32 %v480_v60, %v191_v22  ;;  %v575_v24 = vpop.f32.mrb[13].mxu0  ;;  %624 = vmatmul.mubr.f32.gmra.mrb[10].mxu1 %v200_v21 }
 0x11e   :  { %626 = vmatprep.mubr.msk.f32.mxu1 %vm821_vm0, %v822_v1 }
 0x11f   :  { %v201_v25 = vmax.f32 %v192_v23, 0.0 }
 0x121   :  { %627 = vmatmul.mubr.f32.gmra.mrb[12].mxu1 %v201_v25 }
 0x1dc   :  { %v291_v30 = vpop.f32.mrb[0].mxu1 }
 0x1dd   :  { %v292_v31 = vadd.f32 %v488_v29, %v291_v30  ;;  %v610_v32 = vpop.f32.mrb[1].mxu1 }
 0x1df   :  { %v325_v33 = vmax.f32 %v292_v31, 0.0 }
 0x1e0   :  { %v296_v34 = vpop.f32.mrb[2].mxu1 }
 0x1e1   :  { %v297_v35 = vadd.f32 %v488_v29, %v296_v34  ;;  %v613_v36 = vpop.f32.mrb[3].mxu1  ;;  %662 = vmatmul.mubr.f32.vlgmr.msra.gmra.mrb[14].mxu0 %v325_v33 }
 0x1e2   :  { %664 = vmatprep.mubr.msk.f32.mxu0 %vm821_vm0, %v822_v1 }
 0x1e3   :  { %v326_v37 = vmax.f32 %v297_v35, 0.0 }
 0x1e4   :  { %v301_v38 = vpop.f32.mrb[4].mxu1 }
 0x1e5   :  { %v302_v39 = vadd.f32 %v488_v29, %v301_v38  ;;  %v616_v40 = vpop.f32.mrb[5].mxu1  ;;  %665 = vmatmul.mubr.f32.gmra.mrb[16].mxu0 %v326_v37 }
 0x1e6   :  { %667 = vmatprep.mubr.msk.f32.mxu0 %vm821_vm0, %v822_v1 }
 0x1e7   :  { %v327_v41 = vmax.f32 %v302_v39, 0.0 }
 0x1e8   :  { %v306_v42 = vpop.f32.mrb[6].mxu1 }
 0x1e9   :  { %v307_v43 = vadd.f32 %v488_v29, %v306_v42  ;;  %v619_v44 = vpop.f32.mrb[7].mxu1  ;;  %668 = vmatmul.mubr.f32.gmra.mrb[18].mxu0 %v327_v41 }
 0x1ea   :  { %670 = vmatprep.mubr.msk.f32.mxu0 %vm821_vm0, %v822_v1 }
 0x1eb   :  { %v328_v45 = vmax.f32 %v307_v43, 0.0 }
 0x1ec   :  { %v311_v46 = vpop.f32.mrb[8].mxu1 }
 0x1ed   :  { %v312_v47 = vadd.f32 %v488_v29, %v311_v46  ;;  %v622_v48 = vpop.f32.mrb[9].mxu1  ;;  %671 = vmatmul.mubr.f32.gmra.mrb[20].mxu0 %v328_v45 }
 0x1ee   :  { %673 = vmatprep.mubr.msk.f32.mxu0 %vm821_vm0, %v822_v1 }
 0x1ef   :  { %v329_v49 = vmax.f32 %v312_v47, 0.0 }
 0x1f0   :  { %v316_v50 = vpop.f32.mrb[10].mxu1 }
 0x1f1   :  { %v317_v51 = vadd.f32 %v488_v29, %v316_v50  ;;  %v625_v52 = vpop.f32.mrb[11].mxu1  ;;  %674 = vmatmul.mubr.f32.gmra.mrb[22].mxu0 %v329_v49 }
 0x1f2   :  { %676 = vmatprep.mubr.msk.f32.mxu0 %vm821_vm0, %v822_v1 }
 0x1f3   :  { %v330_v53 = vmax.f32 %v317_v51, 0.0 }
 0x1f4   :  { %v321_v54 = vpop.f32.mrb[12].mxu1 }
 0x1f5   :  { %v322_v55 = vadd.f32 %v488_v29, %v321_v54  ;;  %v628_v56 = vpop.f32.mrb[13].mxu1  ;;  %677 = vmatmul.mubr.f32.gmra.mrb[24].mxu0 %v330_v53 }
 0x1f6   :  { %679 = vmatprep.mubr.msk.f32.mxu0 %vm821_vm0, %v822_v1 }
 0x1f7   :  { %v331_v57 = vmax.f32 %v322_v55, 0.0 }
 0x1f9   :  { %680 = vmatmul.mubr.f32.gmra.mrb[26].mxu0 %v331_v57 }
 0x2b4   :  { %v421_v59 = vpop.f32.mrb[14].mxu0 }
 0x2b5   :  { %v422_v60 = vadd.f32 %v489_v58, %v421_v59  ;;  %v663_v61 = vpop.f32.mrb[15].mxu0 }
 0x2b7   :  { %455 = vst [vmem:[#allocation7] sm:$0xff] %v422_v60 }
 0x2b8   :  { %v426_v62 = vpop.f32.mrb[16].mxu0 }
 0x2b9   :  { %v427_v63 = vadd.f32 %v489_v58, %v426_v62  ;;  %v666_v2 = vpop.f32.mrb[17].mxu0 }
 0x2bb   :  { %456 = vst [vmem:[#allocation7 + $0x8] sm:$0xff] %v427_v63 }
 0x2bc   :  { %v431_v3 = vpop.f32.mrb[18].mxu0 }
 0x2bd   :  { %v432_v4 = vadd.f32 %v489_v58, %v431_v3  ;;  %v669_v5 = vpop.f32.mrb[19].mxu0 }
 0x2bf   :  { %457 = vst [vmem:[#allocation7 + $0x10] sm:$0xff] %v432_v4 }
 0x2c0   :  { %v436_v6 = vpop.f32.mrb[20].mxu0 }
 0x2c1   :  { %v437_v1 = vadd.f32 %v489_v58, %v436_v6  ;;  %v672_v7 = vpop.f32.mrb[21].mxu0 }
 0x2c3   :  { %458 = vst [vmem:[#allocation7 + $0x18] sm:$0xff] %v437_v1 }
 0x2c4   :  { %v441_v8 = vpop.f32.mrb[22].mxu0 }
 0x2c5   :  { %v442_v9 = vadd.f32 %v489_v58, %v441_v8  ;;  %v675_v0 = vpop.f32.mrb[23].mxu0 }
 0x2c7   :  { %459 = vst [vmem:[#allocation7 + $0x20] sm:$0xff] %v442_v9 }
 0x2c8   :  { %v446_v10 = vpop.f32.mrb[24].mxu0 }
 0x2c9   :  { %v447_v11 = vadd.f32 %v489_v58, %v446_v10  ;;  %v678_v12 = vpop.f32.mrb[25].mxu0 }
 0x2cb   :  { %460 = vst [vmem:[#allocation7 + $0x28] sm:$0xff] %v447_v11 }
 0x2cc   :  { %v451_v13 = vpop.f32.mrb[26].mxu0 }
 0x2cd   :  { %v452_v14 = vadd.f32 %v489_v58, %v451_v13  ;;  %v681_v15 = vpop.f32.mrb[27].mxu0 }
 0x2cf   :  { %461 = vst [vmem:[#allocation7 + $0x30] sm:$0x3] %v452_v14 }
 0x2d0   :  { %799 = shalt.err (!%p796_p6)
}
 0x2d1   :  { %s800_s30 = scalar_lea.hbm %s1025_s7, 896 }
 0x2d2   :  { %p801_p7 = scmp.ne.s32.totalorder %s1025_s7, %s800_s30  ;;  %p804_p8 = scmp.lt.u32.totalorder %s800_s30, %s1025_s7 }
 0x2d4   :  { %p806_p9 = pnand %p804_p8, %p801_p7 }
 0x2d6   :  { %809 = shalt.err (!%p806_p9)
}
 0x2d7   :  { %473 = dma.vmem_to_hbm [thread:$0]  %s468_s27, 896, %s1025_s7, [#allocation4], %s817_s11, %s817_s11, %s818_s12  }
 0x2d8   :  { %814 = dma.done.wait [#allocation4], 896  }
 0x2d9   :  { %815 = vsyncadd [#allocation4], 4294966400 }
 0x2da   :  { %477 = vsyncpa [#allocation3], 1 }
 0x2db   :  { %478 = vsyncpa [#allocation6], 1 }
 0x2dc   :  { %479 = vsyncpa [#allocation4], 1 }

</bundles_post_ra>
